<compile_context>
chip_gen: v7x
topology: tpu7x:2x2x1
jax: 0.10.0
libtpu: 0.0.40
codegen_flags: <defaults>
</compile_context>

<pallas_src>
import numpy as np
import jax
import jax.numpy as jnp
from jax import lax
from jax.experimental import pallas as pl
from jax.experimental.pallas import tpu as pltpu


# ----------------------------------------------------------------------------
# Synthetic stand-ins for functions referenced but not defined in the source.
# ----------------------------------------------------------------------------
def generate_filter(n, c):
    # TODO(synk): original generate_filter() not provided in the source file;
    # deterministic synthetic stand-in: Gaussian diagonal band of width c.
    idx = np.arange(n)
    d = (idx[:, None] - idx[None, :]).astype(np.float32)
    return np.exp(-(d ** 2) / (2.0 * float(c) ** 2)).astype(np.float32)


def preprocess(S, pad_param, n_channels):
    # TODO(synk): original preprocess() not provided in the source file;
    # deterministic synthetic stand-in: zero-pad the time (last) axis by
    # round(pad_param * W) and add the NCHW batch dim of 1.
    assert S.shape[0] == n_channels
    pad = int(round(pad_param * S.shape[-1]))
    S = jnp.pad(S, ((0, 0), (0, 0), (0, pad)))
    return S[None]  # (1, C, H, W)


# ----------------------------------------------------------------------------
# VMEM budget: generation-aware (review), fall back conservatively.
# ----------------------------------------------------------------------------
def _vmem_limit_bytes():
    try:
        cap = int(pltpu.get_tpu_info().vmem_capacity_bytes)
        return max(32 * 1024 * 1024, (cap * 3) // 4)   # ~96 MiB v5e/v6e, ~48 MiB v7x
    except Exception:
        return 64 * 1024 * 1024


# ----------------------------------------------------------------------------
# Pallas kernel builder (one compiled callable per filter size / input shape).
# ----------------------------------------------------------------------------
_HC = 8                      # Ho (sublane) chunk processed per inner step
_FILTER_FN_CACHE = {}        # (C, H, W, f.shape, f.bytes) -> jitted callable


def _build_filter_fn(fv, C, H, W):
    """Returns a jitted fn: S (C, H, W) f32 -> (coverage_T (Ho, Wout), rep (Wout,))."""
    n = int(fv.shape[0])
    Ho = (H - n) // n + 1                         # conv output height (stride n)
    Wout = W - n + 1                              # conv output width  (stride 1)
    hc = _HC
    chunks = -(-Ho // hc)                         # Ho chunks per tile
    H_use = Ho * n                                # input rows the strided conv consumes
    H_pad = chunks * hc * n                       # zero-padded rows -> ragged chunks stay exact
    Wt = int(min(512, max(128, -(-Wout // 128) * 128)))   # lane tile (review: 384-512)
    n_wt = -(-Wout // Wt)                         # grid steps over output width
    Wout_pad = n_wt * Wt
    W_ext = Wout_pad + 128                        # room for the 128-lane halo of the last tile
    rep_row = chunks * hc                         # rep folded into spare rows of the cov block
    Ho_out = rep_row + 8
    taps = [[float(fv[a, b]) for b in range(n)] for a in range(n)]  # compile-time consts

    def kernel(main_ref, halo_ref, out_ref, conv_ref):
        # main_ref: (C, H_pad, Wt), halo_ref: (C, H_pad, 128), streamed per W-tile.
        # conv_ref: VMEM scratch (C, chunks*hc, Wt) holding the full conv tile.
        czero = jnp.zeros((C, Wt), jnp.float32)

        def conv_chunk(k, chs):
            # depthwise strided conv for output rows [k*hc, (k+1)*hc): n*n
            # shift-and-accumulate on a small vreg-resident accumulator.
            r0 = k * (hc * n)
            acc = jnp.zeros((C, hc, Wt), jnp.float32)
            for a in range(n):
                if n == 1:
                    rows = pl.ds(r0 + a, hc)
                    win = main_ref[:, rows, :]                      # (C, hc, Wt)
                else:
                    # strided sublane load de-interleaves the stride-n filter rows
                    rows = pl.ds(r0 + a, hc, stride=n)
                    win = jnp.concatenate(
                        [main_ref[:, rows, :], halo_ref[:, rows, :]], axis=-1
                    )                                               # (C, hc, Wt+128)
                for b in range(n):
                    w = taps[a][b]
                    if w != 0.0:
                        acc = acc + w * win[:, :, b:b + Wt]
            conv_ref[:, pl.ds(k * hc, hc), :] = acc                 # one store per chunk
            return chs + jnp.sum(acc, axis=1)                       # channel_score accum

        if chunks == 1:
            chs = conv_chunk(0, czero)
        else:
            chs = lax.fori_loop(0, chunks, conv_chunk, czero)       # bounds live ranges

        # rep = max over channels; idx = first argmax (matches torch.max indices)
        rep = jnp.max(chs, axis=0, keepdims=True)                   # (1, Wt)
        cidx = lax.broadcasted_iota(jnp.int32, (C, Wt), 0)
        idx = jnp.min(jnp.where(chs == rep, cidx, C), axis=0, keepdims=True)
        selmask = (cidx == idx)[:, None, :]                         # (C, 1, Wt)

        def cov_chunk(k, carry):
            blk = conv_ref[:, pl.ds(k * hc, hc), :]                 # (C, hc, Wt)
            out_ref[pl.ds(k * hc, hc), :] = jnp.sum(jnp.where(selmask, blk, 0.0), axis=0)
            return carry

        if chunks == 1:
            cov_chunk(0, 0)
        else:
            lax.fori_loop(0, chunks, cov_chunk, 0)

        # rep folded into the same (lane-dense) output block, spare 8-row group.
        out_ref[pl.ds(rep_row, 8), :] = jnp.broadcast_to(rep, (8, Wt))

    call = pl.pallas_call(
        kernel,
        out_shape=jax.ShapeDtypeStruct((Ho_out, Wout_pad), jnp.float32),
        grid=(n_wt,),
        in_specs=[
            # streamed main block: (C, H_pad, Wt) at lane offset j*Wt
            pl.BlockSpec((C, H_pad, Wt), lambda j: (0, 0, j)),
            # 128-lane halo block starting at (j+1)*Wt (same padded array)
            pl.BlockSpec((C, H_pad, 128), lambda j: (0, 0, (j + 1) * (Wt // 128))),
        ],
        out_specs=pl.BlockSpec((Ho_out, Wt), lambda j: (0, j)),
        scratch_shapes=[pltpu.VMEM((C, chunks * hc, Wt), jnp.float32)],
        compiler_params=pltpu.CompilerParams(
            dimension_semantics=("parallel",),                      # independent W-tiles
            vmem_limit_bytes=_vmem_limit_bytes(),
        ),
        cost_estimate=pl.CostEstimate(
            flops=int(2 * C * chunks * hc * Wout_pad * n * n),
            transcendentals=0,
            bytes_accessed=int(4 * (n_wt * C * H_pad * (Wt + 128) + Ho_out * Wout_pad)),
        ),
    )

    def fn(S):
        # Single wrapper-side zero-pad (no transpose / S4 relayout):
        #   - drop the trailing rows the stride-n conv never uses, zero-pad H to a
        #     chunk multiple so ragged chunks contribute exact zeros to channel_score,
        #   - right-pad W so every lane tile + its 128-lane halo is in bounds.
        S_pad = jnp.pad(S[:, :H_use, :],
                        ((0, 0), (0, H_pad - H_use), (0, W_ext - W)))
        out = call(S_pad, S_pad)
        # native (Ho, Wout) coverage layout (no transpose); rep lives at row rep_row
        return out[:Ho, :Wout], out[rep_row, :Wout]
        # TODO(synk): for inputs where C*H*(Wt+128) itself exceeds per-core VMEM the
        # H axis would additionally need streaming (two-pass over Ho grid); not needed
        # at the shapes exercised here.

    return jax.jit(fn)


def run_filter(S, f):
    """S: (C, H, W) float32, f: (n, n) -> (coverage_T (Ho, Wout), rep (Wout,))."""
    C, H, W = S.shape
    fv = np.asarray(f, dtype=np.float32)
    key = (int(C), int(H), int(W), fv.shape, fv.tobytes())
    fn = _FILTER_FN_CACHE.get(key)
    if fn is None:
        fn = _build_filter_fn(fv, int(C), int(H), int(W))
        _FILTER_FN_CACHE[key] = fn
    return fn(S)


# ----------------------------------------------------------------------------
# Module wrapper (matches FastThumbnail.forward semantics).
# ----------------------------------------------------------------------------
class FastThumbnailPallas:
    def __init__(self, cfg, dims=None):
        if dims is None:
            dims = [1, cfg['max_dim']]
        self.low, self.high = dims
        self.pad_param = cfg['pad_param']
        self.n_channels = cfg['n_channels']
        Ffull = generate_filter(self.high, cfg['filter_width'])
        self.filterbank = []
        for ix in range(self.low, self.high):
            k = (self.high - ix) // 2
            self.filterbank.append(np.asarray(Ffull[k:k + ix, k:k + ix], np.float32))

    def _finalize_coverage(self, cov_T):
        # cov_T is (Ho, Wout) -- kernel-native layout, reduce over axis 0.
        # TODO(synk): torch.median (lower middle element) needs a global sort -> JAX glue.
        N = cov_T.size
        med = jnp.sort(cov_T.reshape(-1))[(N - 1) // 2]
        clean = jnp.where(cov_T <= med, 0.0, cov_T) / jnp.float32(np.sqrt(2.0))
        return clean.sum(axis=0) / ((1.0 + self.pad_param) * clean.shape[0])

    def forward(self, S):
        S = preprocess(S, pad_param=self.pad_param, n_channels=self.n_channels)[0]  # (C,H,W)
        cov_scores, rep_scores = [], []
        for f in self.filterbank:
            if f.shape[0] > S.shape[-1]:
                break
            coverage_T, rep = run_filter(S, f)
            cov_scores.append(self._finalize_coverage(coverage_T))
            rep_scores.append(rep)
        return cov_scores, rep_scores


# ----------------------------------------------------------------------------
# Pure numpy reference (validates the Pallas conv / channel-sum / gather path).
# ----------------------------------------------------------------------------
def ref_filter(S_np, f_np):
    C, H, W = S_np.shape
    n = f_np.shape[0]
    Ho = (H - n) // n + 1
    Wout = W - n + 1
    out = np.zeros((C, Ho, Wout), np.float32)
    for c in range(C):
        for i in range(Ho):
            for j in range(Wout):
                out[c, i, j] = np.sum(S_np[c, i * n:i * n + n, j:j + n] * f_np)
    ch = out.sum(axis=1)
    rep = ch.max(axis=0)
    idx = ch.argmax(axis=0)
    coverage = np.stack([out[idx[i], :, i] for i in range(Wout)])   # (Wout, Ho)
    return coverage, rep


if __name__ == "__main__":
    cfg = {'max_dim': 8, 'pad_param': 0.25, 'n_channels': 4, 'filter_width': 2.0}
    key = jax.random.PRNGKey(0)
    C, T = cfg['n_channels'], 16
    S_in = jax.random.normal(key, (C, T, T), dtype=jnp.float32)

    model = FastThumbnailPallas(cfg)
    cov_scores, rep_scores = model.forward(S_in)
    for x in cov_scores + rep_scores:
        jax.block_until_ready(x)

    # validate the Pallas hot path (conv / channel-sum / argmax gather) vs numpy
    S_pp = np.asarray(preprocess(S_in, cfg['pad_param'], cfg['n_channels'])[0])
    S_pp_j = jnp.asarray(S_pp)
    for f in model.filterbank:
        if f.shape[0] > S_pp.shape[-1]:
            break
        cov_ref, rep_ref = ref_filter(S_pp, np.asarray(f))
        cov_ker, rep_ker = run_filter(S_pp_j, f)                    # cov_ker is (Ho, Wout)
        assert np.allclose(np.asarray(rep_ker), rep_ref, rtol=1e-4, atol=1e-4)
        assert np.allclose(np.asarray(cov_ker), cov_ref.T, rtol=1e-4, atol=1e-4)

    print("KERNEL_OK")
</pallas_src>

<mosaic_0001>
module attributes {stable_mosaic.version = 11 : i64} {
  func.func @kernel(%arg0: i32, %arg1: memref<4x16x128xf32, #tpu.memory_space<vmem>>, %arg2: memref<4x16x128xf32, #tpu.memory_space<vmem>>, %arg3: memref<24x128xf32, #tpu.memory_space<vmem>>, %arg4: memref<4x16x128xf32, #tpu.memory_space<vmem>>) attributes {dimension_semantics = [#tpu.dimension_semantics<parallel>], iteration_bounds = array<i64: 1>, scalar_prefetch = 0 : i64, scratch_operands = 1 : i64, tpu.core_type = #tpu.core_type<tc>, window_params = [{transform_indices = @transform_0, window_bounds = array<i64: 4, 16, 128>}, {transform_indices = @transform_1, window_bounds = array<i64: 4, 16, 128>}, {transform_indices = @transform_2, window_bounds = array<i64: 24, 128>}]} {
    %cst = arith.constant 0.000000e+00 : f32
    %0 = vector.broadcast %cst : f32 to vector<4x128xf32>
    %c0_i32 = arith.constant 0 : i32
    %c2_i32 = arith.constant 2 : i32
    %1 = arith.addi %c0_i32, %c2_i32 : i32
    %c1_i32 = arith.constant 1 : i32
    %2 = scf.for %arg5 = %c0_i32 to %1 step %c1_i32 iter_args(%arg6 = %0) -> (vector<4x128xf32>)  : i32 {
      %c8_i32 = arith.constant 8 : i32
      %19 = arith.muli %arg5, %c8_i32 : i32
      %cst_7 = arith.constant 0.000000e+00 : f32
      %20 = vector.broadcast %cst_7 : f32 to vector<4x8x128xf32>
      %c0_i32_8 = arith.constant 0 : i32
      %21 = arith.addi %19, %c0_i32_8 : i32
      %c0_9 = arith.constant 0 : index
      %22 = arith.index_cast %21 : i32 to index
      %c0_10 = arith.constant 0 : index
      %23 = vector.load %arg1[%c0_9, %22, %c0_10] : memref<4x16x128xf32, #tpu.memory_space<vmem>>, vector<4x8x128xf32>
      %cst_11 = arith.constant 1.000000e+00 : f32
      %24 = vector.broadcast %cst_11 : f32 to vector<4x8x128xf32>
      %25 = arith.mulf %24, %23 : vector<4x8x128xf32>
      %26 = arith.addf %20, %25 : vector<4x8x128xf32>
      %c8_i32_12 = arith.constant 8 : i32
      %27 = arith.muli %arg5, %c8_i32_12 : i32
      %c0_13 = arith.constant 0 : index
      %28 = arith.index_cast %27 : i32 to index
      %c0_14 = arith.constant 0 : index
      %29 = vector.load %arg4[%c0_13, %28, %c0_14] : memref<4x16x128xf32, #tpu.memory_space<vmem>>, vector<4x8x128xf32>
      tpu.vector_store %arg4[%c0_13, %28, %c0_14], %26 {strides = array<i32>} : memref<4x16x128xf32, #tpu.memory_space<vmem>>, vector<4x8x128xf32>,
      %cst_15 = arith.constant dense<0.000000e+00> : vector<4x128xf32>
      %30 = vector.multi_reduction <add>, %26, %cst_15 [1] : vector<4x8x128xf32> to vector<4x128xf32>
      %31 = arith.addf %arg6, %30 : vector<4x128xf32>
      scf.yield %31 : vector<4x128xf32>
    }
    %c2_i32_0 = arith.constant 2 : i32
    %cst_1 = arith.constant dense<0xFF800000> : vector<128xf32>
    %3 = vector.multi_reduction <maximumf>, %2, %cst_1 [0] : vector<4x128xf32> to vector<128xf32>
    %4 = vector.shape_cast %3 : vector<128xf32> to vector<1x128xf32>
    %5 = tpu.iota {dimensions = array<i32: 0>} : vector<4x128xi32>
    %6 = vector.broadcast %4 : vector<1x128xf32> to vector<4x128xf32>
    %7 = arith.cmpf oeq, %2, %6 : vector<4x128xf32>
    %c4_i32 = arith.constant 4 : i32
    %8 = vector.broadcast %c4_i32 : i32 to vector<4x128xi32>
    %9 = arith.select %7, %5, %8 : vector<4x128xi1>, vector<4x128xi32>
    %cst_2 = arith.constant dense<2147483647> : vector<128xi32>
    %10 = vector.multi_reduction <minsi>, %9, %cst_2 [0] : vector<4x128xi32> to vector<128xi32>
    %11 = vector.shape_cast %10 : vector<128xi32> to vector<1x128xi32>
    %12 = vector.broadcast %11 : vector<1x128xi32> to vector<4x128xi32>
    %13 = arith.cmpi eq, %5, %12 : vector<4x128xi32>
    %14 = vector.shape_cast %13 : vector<4x128xi1> to vector<4x1x128xi1>
    %c0_i32_3 = arith.constant 0 : i32
    %c2_i32_4 = arith.constant 2 : i32
    %15 = arith.addi %c0_i32_3, %c2_i32_4 : i32
    %c1_i32_5 = arith.constant 1 : i32
    scf.for %arg5 = %c0_i32_3 to %15 step %c1_i32_5  : i32 {
      %c8_i32 = arith.constant 8 : i32
      %19 = arith.muli %arg5, %c8_i32 : i32
      %c0_7 = arith.constant 0 : index
      %20 = arith.index_cast %19 : i32 to index
      %c0_8 = arith.constant 0 : index
      %21 = vector.load %arg4[%c0_7, %20, %c0_8] : memref<4x16x128xf32, #tpu.memory_space<vmem>>, vector<4x8x128xf32>
      %cst_9 = arith.constant 0.000000e+00 : f32
      %22 = vector.shape_cast %14 : vector<4x1x128xi1> to vector<4x1x128xi1>
      %23 = vector.broadcast %22 : vector<4x1x128xi1> to vector<4x8x128xi1>
      %24 = vector.broadcast %cst_9 : f32 to vector<4x8x128xf32>
      %25 = arith.select %23, %21, %24 : vector<4x8x128xi1>, vector<4x8x128xf32>
      %cst_10 = arith.constant dense<0.000000e+00> : vector<8x128xf32>
      %26 = vector.multi_reduction <add>, %25, %cst_10 [0] : vector<4x8x128xf32> to vector<8x128xf32>
      %c8_i32_11 = arith.constant 8 : i32
      %27 = arith.muli %arg5, %c8_i32_11 : i32
      %28 = arith.index_cast %27 : i32 to index
      %c0_12 = arith.constant 0 : index
      %29 = vector.load %arg3[%28, %c0_12] : memref<24x128xf32, #tpu.memory_space<vmem>>, vector<8x128xf32>
      tpu.vector_store %arg3[%28, %c0_12], %26 {strides = array<i32>} : memref<24x128xf32, #tpu.memory_space<vmem>>, vector<8x128xf32>,
    }
    %c2_i32_6 = arith.constant 2 : i32
    %16 = vector.shape_cast %4 : vector<1x128xf32> to vector<1x128xf32>
    %17 = vector.broadcast %16 : vector<1x128xf32> to vector<8x128xf32>
    %c16 = arith.constant 16 : index
    %c0 = arith.constant 0 : index
    %18 = vector.load %arg3[%c16, %c0] : memref<24x128xf32, #tpu.memory_space<vmem>>, vector<8x128xf32>
    tpu.vector_store %arg3[%c16, %c0], %17 {strides = array<i32>} : memref<24x128xf32, #tpu.memory_space<vmem>>, vector<8x128xf32>,
    return
  }
  func.func @transform_0(%arg0: i32) -> (i32, i32, i32) {
    %c0_i32 = arith.constant 0 : i32
    %c0_i32_0 = arith.constant 0 : i32
    %c0_i32_1 = arith.constant 0 : i32
    return %c0_i32, %c0_i32_0, %arg0 : i32, i32, i32
  }
  func.func @transform_1(%arg0: i32) -> (i32, i32, i32) {
    %c1_i32 = arith.constant 1 : i32
    %0 = arith.addi %arg0, %c1_i32 : i32
    %c1_i32_0 = arith.constant 1 : i32
    %1 = arith.muli %0, %c1_i32_0 : i32
    %c0_i32 = arith.constant 0 : i32
    %c0_i32_1 = arith.constant 0 : i32
    %c0_i32_2 = arith.constant 0 : i32
    return %c0_i32, %c0_i32_1, %1 : i32, i32, i32
  }
  func.func @transform_2(%arg0: i32) -> (i32, i32) {
    %c0_i32 = arith.constant 0 : i32
    %c0_i32_0 = arith.constant 0 : i32
    return %c0_i32, %arg0 : i32, i32
  }
}

</mosaic_0001>

<bundles_post_ra>
// kernel: fn.1
= control target key start
LH: loop header
LB: loop body
LE: loop exit
PB: predicated region body
PF: predicated region fallthrough
CT: control target
= control target key end

     0   :  { %7 = vsyncpa [#allocation4], 0  ;;  %s548_s0 = inlined_call_operand.hbm [shape: f32[4,16,256], index: 0, kind: input, shape index: {}, may-alias: {0,1}]   ;;  %s549_s1 = inlined_call_operand.hbm [shape: f32[4,16,256], index: 1, kind: input, shape index: {}, may-alias: {0,1}]   ;;  %s550_s2 = inlined_call_operand.hbm [shape: f32[24,128], index: 2, kind: output, shape index: {}]  }
   0x1   :  { %8 = vsyncpa [#allocation7], 0 }
   0x2   :  { %9 = vsyncpa [#allocation5], 0  ;;  %s435_s9 = smov [#allocation3]   ;;  %s312_s13 = scalar_lea.hbm %s548_s0, 1024 }
   0x3   :  { %s15_s10 = sshll.u32 %s435_s9, 4  ;;  %p313_p0 = scmp.ne.s32.totalorder %s548_s0, %s312_s13  ;;  %s16_s10 = int_to_ptr.vmem [resolvable:$true] %s15_s10 }
   0x4   :  { %s314_s18 = scalar_lea.hbm %s548_s0, 2048  ;;  %p316_p2 = scmp.lt.u32.totalorder %s312_s13, %s548_s0 }
   0x5   :  { %p315_p1 = scmp.lt.u32.totalorder %s314_s18, %s312_s13 }
   0x7   :  { %p317_p3 = por %p316_p2, %p315_p1 }
   0x9   :  { %p318_p4 = pnand %p317_p3, %p313_p0 }
   0xb   :  { %321 = shalt.err (!%p318_p4)
}
   0xc   :  { %s322_s21 = scalar_lea.vmem %s16_s10, 1024  ;;  %p327_p6 = scmp.lt.s32.totalorder %s16_s10, %s16_s10 }
   0xd   :  { %p323_p5 = scmp.ne.s32.totalorder %s16_s10, %s322_s21  ;;  %p328_p7 = scmp.lt.s32.totalorder %s322_s21, %s322_s21 }
   0xf   :  { %p329_p8 = por %p328_p7, %p327_p6 }
  0x11   :  { %p330_p9 = pnand %p329_p8, %p323_p5 }
  0x13   :  { %333 = shalt.err (!%p330_p9)
}
  0x14   :  { %s436_s22 = smov 256   ;;  %s437_s23 = smov 128  }
  0x15   :  { %s438_s24 = smov 8   ;;  %s222_s29 = scalar_lea.hbm %s549_s1, 128 }
  0x16   :  { %21 = dma.hbm_to_vmem [thread:$0]  %s548_s0, 1024, %s16_s10, [#allocation4], %s436_s22, %s437_s23, %s438_s24  }
  0x17   :  { %s439_s30 = smov [#allocation6]   ;;  %s358_s6 = scalar_lea.hbm %s549_s1, 1152 }
  0x18   :  { %s30_s3 = sshll.u32 %s439_s30, 4  ;;  %p335_p10 = scmp.ne.s32.totalorder %s222_s29, %s358_s6  ;;  %s31_s3 = int_to_ptr.vmem [resolvable:$true] %s30_s3 }
  0x19   :  { %s336_s9 = scalar_lea.hbm %s549_s1, 2048  ;;  %p337_p11 = scmp.lt.u32.totalorder %s222_s29, %s549_s1 }
  0x1a   :  { %p338_p12 = scmp.lt.u32.totalorder %s336_s9, %s358_s6  ;;  %p340_p0 = scmp.lt.u32.totalorder %s358_s6, %s222_s29 }
  0x1c   :  { %p339_p13 = por %p338_p12, %p337_p11 }
  0x1e   :  { %p341_p1 = por %p340_p0, %p339_p13 }
  0x20   :  { %p342_p2 = pnand %p341_p1, %p335_p10 }
  0x22   :  { %345 = shalt.err (!%p342_p2)
}
  0x23   :  { %s346_s0 = scalar_lea.vmem %s31_s3, 1024  ;;  %p351_p4 = scmp.lt.s32.totalorder %s31_s3, %s31_s3 }
  0x24   :  { %p347_p3 = scmp.ne.s32.totalorder %s31_s3, %s346_s0  ;;  %p352_p5 = scmp.lt.s32.totalorder %s346_s0, %s346_s0 }
  0x26   :  { %p353_p6 = por %p352_p5, %p351_p4 }
  0x28   :  { %p354_p7 = pnand %p353_p6, %p347_p3 }
  0x2a   :  { %357 = shalt.err (!%p354_p7)
}
  0x2b   :  { %36 = dma.hbm_to_vmem [thread:$0]  %s222_s29, 1024, %s31_s3, [#allocation7], %s436_s22, %s437_s23, %s438_s24  }
  0x2c   :  { %405 = dma.done.wait [#allocation4], 1024  }
  0x2d   :  { %406 = vsyncadd [#allocation4], 4294966272 }
  0x2e   :  { %407 = dma.done.wait [#allocation7], 1024  }
  0x2f   :  { %408 = vsyncadd [#allocation7], 4294966272  ;;  %v411_v0 = vmov 0.0   ;;  %v415_v1 = vmov 0.0   ;;  %v419_v2 = vmov 0.0   ;;  %v423_v3 = vmov 0.0  }
  0x30   :  { %s490_s1 = smov 0  }
  0x31 LB: > { %s253_s10 = sshll.u32 %s429_s1, 3  ;;  %s49_s1 = sadd.s32 1, %s429_s1   ;;  %s429_s1 = sphi %s490_s1, %s49_s1   ;;  %v425_v3 = vphi %v423_v3, %v424_v3   ;;  %v421_v2 = vphi %v419_v2, %v420_v2   ;;  %v417_v1 = vphi %v415_v1, %v416_v1   ;;  %v413_v0 = vphi %v411_v0, %v412_v0  }
  0x32   : > { %s55_s13 = scalar_lea.vmem [#allocation3], %s253_s10  ;;  %s64_s14 = scalar_lea.vmem [#allocation2], %s253_s10 }
  0x33   : > { %v56_v4 = vld [vmem:[%s55_s13] sm:$0xff]  ;;  %v57_v5 = vld [vmem:[%s55_s13 + $0x10] sm:$0xff]  ;;  %p46_p8 = scmp.ge.s32.totalorder %s49_s1, 2  }
  0x34   : > { %v58_v6 = vld [vmem:[%s55_s13 + $0x20] sm:$0xff]  ;;  %65 = vst [vmem:[%s64_s14] sm:$0xff] %v56_v4  ;;  %v69_v7 = vrot.slane %v56_v4, 4  ;;  %66 = vst [vmem:[%s64_s14 + $0x10] sm:$0xff] %v57_v5  ;;  %v75_v8 = vrot.slane %v57_v5, 4  ;;  %v59_v10 = vld [vmem:[%s55_s13 + $0x30] sm:$0xff]  ;;  %v100_v38 = vlaneseq (%p46_p8)  ;;  %vm113_vm0 = vcmask (%p46_p8), 1040384  }
  0x35   : > { %67 = vst [vmem:[%s64_s14 + $0x20] sm:$0xff] %v58_v6  ;;  %v81_v9 = vrot.slane %v58_v6, 4  ;;  %68 = vst [vmem:[%s64_s14 + $0x30] sm:$0xff] %v59_v10  ;;  %v87_v11 = vrot.slane %v59_v10, 4  ;;  %v440_v41 = vmov (%p46_p8), 1966171168  }
  0x36   : > { %v70_v12 = vadd.f32 %v69_v7, %v56_v4  ;;  %v76_v13 = vadd.f32 %v75_v8, %v57_v5  ;;  %v101_v40 = vshrl.u32 (%p46_p8), %v100_v38, 7  ;;  %v131_v42 = vunpack.c.l.s4 (%p46_p8), %v440_v41  ;;  %s517_s15 = smov (%p46_p8), 0  }
  0x37   : > { %v82_v14 = vadd.f32 %v81_v9, %v58_v6  ;;  %v88_v15 = vadd.f32 %v87_v11, %v59_v10  ;;  %v441_v61 = vmov (%p46_p8), 0  }
  0x38   : > { %v71_v16 = vrot.slane %v70_v12, 2  ;;  %v77_v17 = vrot.slane %v76_v13, 2  ;;  %v106_v43 = vrot.slane (%p46_p8), %v101_v40, 1  ;;  %v107_v44 = vrot.slane (%p46_p8), %v101_v40, 2 }
  0x39   : > { %v83_v18 = vrot.slane %v82_v14, 2  ;;  %v89_v19 = vrot.slane %v88_v15, 2  ;;  %v108_v45 = vrot.slane (%p46_p8), %v101_v40, 3  ;;  %v126_v54 = vsub.s32 (%p46_p8), 0, %v101_v40 }
  0x3a   : > { %v72_v20 = vadd.f32 %v71_v16, %v70_v12  ;;  %v78_v21 = vadd.f32 %v77_v17, %v76_v13  ;;  %v132_v55 = vunpack.c.0.s8 (%p46_p8), %v131_v42 }
  0x3b   : > { %v84_v22 = vadd.f32 %v83_v18, %v82_v14  ;;  %v90_v23 = vadd.f32 %v89_v19, %v88_v15 }
  0x3c   : > { %v73_v24 = vrot.slane %v72_v20, 1  ;;  %v79_v25 = vrot.slane %v78_v21, 1  ;;  %v135_v60 = vsub.s32 (%p46_p8), %v132_v55, %v101_v40 }
  0x3d   : > { %v85_v26 = vrot.slane %v84_v22, 1  ;;  %v91_v27 = vrot.slane %v90_v23, 1  ;;  %48 = sbr.rel (!%p46_p8) target bundleno = 49 (0x31), region = 55 }
  0x3e   : > { %v74_v28 = vadd.f32 %v73_v24, %v72_v20  ;;  %v80_v29 = vadd.f32 %v79_v25, %v78_v21 }
  0x3f   : > { %v86_v30 = vadd.f32 %v85_v26, %v84_v22  ;;  %v92_v31 = vadd.f32 %v91_v27, %v90_v23 }
  0x40   : > { %v93_v32 = vadd.f32 %v425_v3, %v74_v28   ;;  %v94_v33 = vadd.f32 %v421_v2, %v80_v29  }
  0x41   : > { %v95_v34 = vadd.f32 %v417_v1, %v86_v30   ;;  %v96_v35 = vadd.f32 %v413_v0, %v92_v31  }
  0x42   : > { %v420_v2 = vmov %v94_v33   ;;  %v424_v3 = vmov %v93_v32   ;;  %v97_v36 = vmax.f32 (%p46_p8), %v93_v32, %v94_v33 }
  0x43   : > { %v412_v0 = vmov %v96_v35   ;;  %v416_v1 = vmov %v95_v34   ;;  %v98_v37 = vmax.f32 (%p46_p8), %v95_v34, %v96_v35 }
  0x45   :  { %v499_v39 = vmax.f32 %v97_v36, %v98_v37 }
  0x47   :  { %vm102_vm1 = vcmp.eq.f32.partialorder %v93_v32, %v499_v39  ;;  %vm103_vm2 = vcmp.eq.f32.partialorder %v94_v33, %v499_v39  ;;  %vm104_vm3 = vcmp.eq.f32.partialorder %v95_v34, %v499_v39  ;;  %vm105_vm4 = vcmp.eq.f32.partialorder %v96_v35, %v499_v39 }
  0x48   :  { %v109_v46 = vsel %vm102_vm1, %v101_v40, 4  ;;  %v110_v48 = vsel %vm103_vm2, %v106_v43, 4  ;;  %v111_v49 = vsel %vm104_vm3, %v107_v44, 4  ;;  %v112_v50 = vsel %vm105_vm4, %v108_v45, 4 }
  0x49   :  { %v114_v47 = vsel %vm113_vm0, %v109_v46, 2147483647  ;;  %v115_v51 = vsel %vm113_vm0, %v110_v48, 2147483647  ;;  %v116_v52 = vsel %vm113_vm0, %v111_v49, 2147483647 }
  0x4a   :  { %v117_v53 = vsel %vm113_vm0, %v112_v50, 2147483647  ;;  %vm118_vm5 = vcmp.lt.s32.totalorder %v114_v47, %v115_v51 }
  0x4b   :  { %vm120_vm6 = vcmp.lt.s32.totalorder %v116_v52, %v117_v53  ;;  %v119_v56 = vsel %vm118_vm5, %v114_v47, %v115_v51 }
  0x4c   :  { %v121_v57 = vsel %vm120_vm6, %v116_v52, %v117_v53 }
  0x4d   :  { %vm122_vm7 = vcmp.lt.s32.totalorder %v119_v56, %v121_v57 }
  0x4e   :  { %v123_v58 = vsel %vm122_vm7, %v119_v56, %v121_v57 }
  0x4f   :  { %v127_v59 = vrot.slane %v123_v58, %v126_v54 }
  0x51   :  { %vm128_vm8 = vcmp.eq.s32.totalorder %v101_v40, %v127_v59 }
  0x52   :  { %v129_v62 = vsel %vm128_vm8, 1, %v441_v61 }
  0x53   :  { %v136_v63 = vrot.slane %v129_v62, %v135_v60 }
  0x55   :  { %v137_v0 = vcombine.high %v136_v63, %v136_v63  ;;  %v144_v1 = vrot.slane %v136_v63, %v135_v60 }
  0x57   :  { %v151_v2 = vrot.slane %v137_v0, %v135_v60  ;;  %v152_v3 = vcombine.high %v144_v1, %v144_v1  ;;  %vm154_vm9 = vcmp.ne.s32.totalorder %v144_v1, 0 }
  0x59   :  { %v153_v4 = vcombine.high %v151_v2, %v151_v2  ;;  %vm155_vm10 = vcmp.ne.s32.totalorder %v151_v2, 0  ;;  %vm509_vm11 = vcmp.ne.s32.totalorder %v152_v3, 0 }
  0x5b   :  { %vm513_vm12 = vcmp.ne.s32.totalorder %v153_v4, 0 }
  0x5c LB: > { %v442_v7 = vmov 0   ;;  %s254_s16 = sshll.u32 %s433_s15, 3  ;;  %s163_s15 = sadd.s32 1, %s433_s15   ;;  %s433_s15 = sphi %s517_s15, %s163_s15  }
  0x5d   : > { %v170_v8 = vsel %vm154_vm9, 1, %v442_v7  ;;  %v171_v9 = vsel %vm155_vm10, 1, %v442_v7  ;;  %v172_v10 = vsel %vm509_vm11, 1, %v442_v7  ;;  %v173_v11 = vsel %vm513_vm12, 1, %v442_v7  ;;  %s165_s17 = scalar_lea.vmem [#allocation2], %s254_s16  ;;  %s201_s18 = scalar_lea.vmem [#allocation8], %s254_s16 }
  0x5e   : > { %v177_v12 = vrot.slane %v170_v8, %v126_v54  ;;  %v181_v13 = vrot.slane %v171_v9, %v126_v54  ;;  %v185_v14 = vrot.slane %v172_v10, %v126_v54  ;;  %v189_v15 = vrot.slane %v173_v11, %v126_v54  ;;  %v166_v16 = vld [vmem:[%s165_s17] sm:$0xff]  ;;  %v167_v17 = vld [vmem:[%s165_s17 + $0x10] sm:$0xff]  ;;  %p160_p9 = scmp.ge.s32.totalorder %s163_s15, 2  }
  0x5f   : > { %v168_v18 = vld [vmem:[%s165_s17 + $0x20] sm:$0xff]  ;;  %v169_v19 = vld [vmem:[%s165_s17 + $0x30] sm:$0xff]  ;;  %s443_s19 = smov (%p160_p9), [#allocation8]  }
  0x60   : > { %vm190_vm13 = vcmp.eq.s32.totalorder %v177_v12, 1  ;;  %vm191_vm14 = vcmp.eq.s32.totalorder %v181_v13, 1  ;;  %vm192_vm15 = vcmp.eq.s32.totalorder %v185_v14, 1  ;;  %vm193_vm0 = vcmp.eq.s32.totalorder %v189_v15, 1  ;;  %s209_s20 = sshll.u32 (%p160_p9), %s443_s19, 4  ;;  %s210_s20 = int_to_ptr.vmem [resolvable:$true] %s209_s20 }
  0x61   : > { %v194_v20 = vsel %vm190_vm13, %v166_v16, 0.0  ;;  %v195_v21 = vsel %vm191_vm14, %v167_v17, 0.0  ;;  %v196_v22 = vsel %vm192_vm15, %v168_v18, 0.0  ;;  %v197_v24 = vsel %vm193_vm0, %v169_v19, 0.0  ;;  %s359_s21 = scalar_lea.vmem (%p160_p9), %s210_s20, 384  ;;  %p364_p11 = scmp.lt.s32.totalorder (%p160_p9), %s210_s20, %s210_s20 }
  0x62   : > { %v198_v23 = vadd.f32 %v195_v21, %v194_v20  ;;  %162 = sbr.rel (!%p160_p9) target bundleno = 92 (0x5c), region = 66  ;;  %p360_p10 = scmp.ne.s32.totalorder (%p160_p9), %s210_s20, %s359_s21 }
  0x63   :  { %p365_p12 = scmp.lt.s32.totalorder (%p160_p9), %s359_s21, %s359_s21 }
  0x64   : > { %v199_v25 = vadd.f32 %v198_v23, %v196_v22 }
  0x65   :  { %p366_p13 = por (%p160_p9), %p365_p12, %p364_p11 }
  0x66   : > { %v200_v26 = vadd.f32 %v199_v25, %v197_v24 }
  0x67   :  { %p367_p0 = pnand (%p160_p9), %p366_p13, %p360_p10 }
  0x68   : > { %202 = vst [vmem:[%s201_s18] sm:$0xff] %v200_v26 }
  0x69   :  { %203 = vst [vmem:[#allocation8 + $0x10] sm:$0xff] %v499_v39 }
  0x6a   :  { %370 = shalt.err (!%p367_p0)
}
  0x6b   :  { %s371_s26 = scalar_lea.hbm %s550_s2, 384 }
  0x6c   :  { %p372_p1 = scmp.ne.s32.totalorder %s550_s2, %s371_s26  ;;  %p375_p2 = scmp.lt.u32.totalorder %s371_s26, %s550_s2 }
  0x6e   :  { %p377_p3 = pnand %p375_p2, %p372_p1 }
  0x70   :  { %380 = shalt.err (!%p377_p3)
}
  0x71   :  { %215 = dma.vmem_to_hbm [thread:$0]  %s210_s20, 384, %s550_s2, [#allocation5], %s437_s23, %s437_s23, %s438_s24  }
  0x72   :  { %409 = dma.done.wait [#allocation5], 384  }
  0x73   :  { %410 = vsyncadd [#allocation5], 4294966912 }
  0x74   :  { %219 = vsyncpa [#allocation4], 1 }
  0x75   :  { %220 = vsyncpa [#allocation7], 1 }
  0x76   :  { %221 = vsyncpa [#allocation5], 1 }

</bundles_post_ra>
